<compile_context>
chip_gen: v7x
topology: tpu7x:2x2x1
jax: 0.10.0
libtpu: 0.0.40
codegen_flags: <defaults>
</compile_context>

<pallas_src>
from collections import OrderedDict

import jax
import jax.numpy as jnp
from jax.experimental import pallas as pl
from jax.experimental.pallas import tpu as pltpu

LANE = 128      # vreg lane width (last dim)
SUBLANE = 8     # vreg sublane width (second-to-last dim)


def _round_up(n, m):
    return (n + m - 1) // m * m


def _pad2(x, rows, cols):
    """Zero-pad a 2-D array up to (rows, cols)."""
    r, c = x.shape
    if (r, c) == (rows, cols):
        return x
    return jnp.zeros((rows, cols), x.dtype).at[:r, :c].set(x)


# --------------------------- Submodules (jnp-level) -------------------------- #
# Each submodule exposes:
#   * param_arrays(): pre-transposed / lane-padded parameters (hoisted at init)
#   * apply(params, inputs): pure-jnp compute, traced INSIDE the fused Pallas
#     kernel body (params are values loaded from kernel refs)
#   * __call__(inputs): plain-JAX reference path with PyTorch semantics, used
#     only for correctness checking of the DAG orchestration.

class PallasModule:
    def param_arrays(self):
        return ()

    def apply(self, params, inputs):
        raise NotImplementedError


class Linear(PallasModule):
    """Matches torch.nn.Linear(in_f, out_f): weight (out_f, in_f), bias (out_f,)."""

    def __init__(self, key, in_f, out_f):
        k1, k2 = jax.random.split(key)
        bound = 1.0 / (in_f ** 0.5)
        self.weight = jax.random.uniform(k1, (out_f, in_f), jnp.float32, -bound, bound)
        self.bias = jax.random.uniform(k2, (out_f,), jnp.float32, -bound, bound)
        self.in_f, self.out_f = in_f, out_f
        # Hoisted once at init: transpose to (in, out), reshape bias to (1, out),
        # and zero-pad both to 128-lane multiples for lane-dense MXU tiles.
        in_p, out_p = _round_up(in_f, LANE), _round_up(out_f, LANE)
        w_t = _pad2(self.weight.T, in_p, out_p)            # (In_pad, Out_pad)
        b = _pad2(self.bias.reshape(1, out_f), 1, out_p)   # (1, Out_pad)
        self._padded_params = (w_t, b)

    def param_arrays(self):
        return self._padded_params

    def apply(self, params, x):
        w_t, b = params
        y = jnp.dot(x, w_t, preferred_element_type=jnp.float32)
        return y + b

    def __call__(self, x):  # pure-JAX reference path (PyTorch semantics)
        return x @ self.weight.T + self.bias


class ReLU(PallasModule):
    def apply(self, params, x):
        return jnp.maximum(x, 0.0)

    def __call__(self, x):
        return jnp.maximum(x, 0.0)


class Add(PallasModule):
    """Receives a tuple of two tensors (DAG collection input) and adds them."""

    def apply(self, params, inputs):
        a, b = inputs
        return a + b

    def __call__(self, inputs):
        a, b = inputs
        return a + b


# ----------------------------- DAG (faithful port) -------------------------- #

class DAG:
    """Generic directed acyclic graph of submodules (port of the torch module).

    Graph wiring / dict bookkeeping is host-side Python; all tensor compute of
    the submodules is executed inside Pallas (via the fused kernel builder)."""

    def __init__(self):
        self._modules = OrderedDict()
        self.inputs = dict()
        self.outputs = set()
        self.extra_outputs = set()
        self.lifetimes = dict()

    def add_module(self, name, module):
        self._modules[name] = module

    def append(self, module, to=None, name=None, as_output=False):
        idx = len(self._modules)
        if to is None and self._modules:
            to = next(reversed(self._modules))
        if name is None:
            name = str(idx)
        self.add_module(name, module)
        if isinstance(to, set):
            to = {k: k for k in to}
        self.inputs[name] = to
        if isinstance(to, str):
            to = (to,)
        if to is not None:
            for k in to:
                self.lifetimes[k] = idx
                self.outputs.discard(k)
        self.outputs.add(name)
        if as_output:
            self.extra_outputs.add(name)
        return self

    def forward(self, data):
        data = dict(data)

        def take_data(name, idx):
            if self.lifetimes.get(name, -1) == idx:
                return data.pop(name)
            else:
                return data[name]

        outputs = OrderedDict()
        output_keys = self.outputs | self.extra_outputs
        for idx, (name, module) in enumerate(self._modules.items()):
            inputs = self.inputs[name]
            if inputs is None:
                inputs = data
            elif isinstance(inputs, str):
                inputs = take_data(inputs, idx)
            elif isinstance(inputs, (list, tuple)):
                inputs = type(inputs)((take_data(k, idx) for k in inputs))
            elif isinstance(inputs, dict):
                inputs = type(inputs)(((k, take_data(k, idx)) for k in inputs))
            output = module(inputs)
            data[name] = output
            if name in output_keys:
                outputs[name] = output
        return outputs

    __call__ = forward


class _BoundModule:
    """Module bound to parameter *values* loaded from kernel refs."""

    def __init__(self, module, params):
        self._m, self._p = module, params

    def __call__(self, inputs):
        return self._m.apply(self._p, inputs)


# ----------------------- Fused whole-DAG Pallas kernel ----------------------- #

def build_fused_dag(dag, input_name, in_width, batch, out_widths):
    """Fuse the whole DAG into a single Pallas kernel.

    Returns a callable: x (batch, in_width) -> OrderedDict of outputs with the
    exact key set / ordering of DAG.forward({input_name: x}).
    """
    modules = list(dag._modules.items())

    # Flatten parameters (already pre-transposed / lane-padded) in module order.
    flat_params, slices = [], []
    for _, m in modules:
        ps = tuple(m.param_arrays())
        slices.append((len(flat_params), len(flat_params) + len(ps)))
        flat_params.extend(ps)

    output_keys = dag.outputs | dag.extra_outputs
    output_names = [n for n, _ in modules if n in output_keys]

    b_pad = _round_up(batch, SUBLANE)
    in_pad = _round_up(in_width, LANE)

    def traced_forward(x_val, param_vals):
        # Shadow DAG with identical wiring, whose modules are bound to the
        # loaded parameter values; the ORIGINAL forward() orchestration runs
        # at trace time on jnp values (inside the kernel body).
        bound = DAG()
        for (name, m), (lo, hi) in zip(modules, slices):
            bound._modules[name] = _BoundModule(m, tuple(param_vals[lo:hi]))
        bound.inputs = dag.inputs
        bound.outputs = dag.outputs
        bound.extra_outputs = dag.extra_outputs
        bound.lifetimes = dag.lifetimes
        return bound.forward({input_name: x_val})

    # Padded output shapes for pallas_call, via an abstract pass (no compute).
    x_abs = jax.ShapeDtypeStruct((b_pad, in_pad), jnp.float32)
    p_abs = [jax.ShapeDtypeStruct(p.shape, p.dtype) for p in flat_params]
    outs_abs = jax.eval_shape(
        lambda xv, pv: tuple(traced_forward(xv, pv).values()), x_abs, p_abs)
    out_shape = tuple(jax.ShapeDtypeStruct(o.shape, o.dtype) for o in outs_abs)

    n_in = 1 + len(flat_params)

    def kernel(*refs):
        in_refs, out_refs = refs[:n_in], refs[n_in:]
        x_val = in_refs[0][...]
        param_vals = [r[...] for r in in_refs[1:]]
        outs = traced_forward(x_val, param_vals)  # entire DAG, fused in-kernel
        for r, v in zip(out_refs, outs.values()):
            r[...] = v.astype(r.dtype)

    vmem = pl.BlockSpec(memory_space=pltpu.MemorySpace.VMEM)
    fused_call = pl.pallas_call(
        kernel,
        out_shape=out_shape,
        in_specs=[vmem] * n_in,
        out_specs=tuple(vmem for _ in out_shape),
    )

    @jax.jit
    def run_padded(x):
        xp = _pad2(x, b_pad, in_pad)
        outs = fused_call(xp, *flat_params)
        if not isinstance(outs, (tuple, list)):
            outs = (outs,)
        # Slice back to logical (unpadded) widths under the same jit.
        return tuple(o[:batch, :out_widths[name]]
                     for name, o in zip(output_names, outs))

    def run(x):
        vals = run_padded(x)
        return OrderedDict(zip(output_names, vals))

    return run


# ---------------------------------- main ------------------------------------ #

if __name__ == "__main__":
    key = jax.random.PRNGKey(0)
    kx, k_fc1, k_fc2 = jax.random.split(key, 3)

    B, D, H = 8, 32, 64
    x = jax.random.normal(kx, (B, D), jnp.float32)

    fc1 = Linear(k_fc1, D, H)
    fc2 = Linear(k_fc2, H, D)

    # DAG:  x -> fc1 -> relu -> fc2 --+--> res (residual add with x)
    #                         (fc2 is also an extra output, as_output=True)
    dag = DAG()
    dag.append(fc1, to="x", name="fc1")
    dag.append(ReLU(), name="act")
    dag.append(fc2, name="fc2", as_output=True)
    dag.append(Add(), to=("x", "fc2"), name="res")

    # Single fused Pallas kernel for the whole DAG, under one jax.jit.
    run = build_fused_dag(dag, input_name="x", in_width=D, batch=B,
                          out_widths={"fc2": D, "res": D})

    outs = run(x)
    for v in outs.values():
        jax.block_until_ready(v)

    # Reference 1: the DAG's own forward() orchestration in plain JAX.
    ref_dag = dag({"x": x})
    # Reference 2: manual PyTorch-semantics math.
    y1 = x @ fc1.weight.T + fc1.bias
    y2 = jnp.maximum(y1, 0.0)
    y3 = y2 @ fc2.weight.T + fc2.bias
    res = x + y3

    assert list(outs.keys()) == ["fc2", "res"], list(outs.keys())
    assert list(ref_dag.keys()) == ["fc2", "res"], list(ref_dag.keys())
    assert outs["fc2"].shape == (B, D) and outs["res"].shape == (B, D)
    assert jnp.allclose(outs["fc2"], y3, atol=2e-3, rtol=2e-3)
    assert jnp.allclose(outs["res"], res, atol=2e-3, rtol=2e-3)
    assert jnp.allclose(outs["fc2"], ref_dag["fc2"], atol=2e-3, rtol=2e-3)
    assert jnp.allclose(outs["res"], ref_dag["res"], atol=2e-3, rtol=2e-3)

    print("KERNEL_OK")
</pallas_src>

<mosaic_0001>
module attributes {stable_mosaic.version = 11 : i64} {
  func.func @kernel(%arg0: memref<8x128xf32, #tpu.memory_space<vmem>>, %arg1: memref<128x128xf32, #tpu.memory_space<vmem>>, %arg2: memref<1x128xf32, #tpu.memory_space<vmem>>, %arg3: memref<128x128xf32, #tpu.memory_space<vmem>>, %arg4: memref<1x128xf32, #tpu.memory_space<vmem>>, %arg5: memref<8x128xf32, #tpu.memory_space<vmem>>, %arg6: memref<8x128xf32, #tpu.memory_space<vmem>>) attributes {dimension_semantics = [], scalar_prefetch = 0 : i64, scratch_operands = 0 : i64, tpu.core_type = #tpu.core_type<tc>} {
    %c0 = arith.constant 0 : index
    %c0_0 = arith.constant 0 : index
    %0 = vector.load %arg0[%c0, %c0_0] : memref<8x128xf32, #tpu.memory_space<vmem>>, vector<8x128xf32>
    %c0_1 = arith.constant 0 : index
    %c0_2 = arith.constant 0 : index
    %1 = vector.load %arg1[%c0_1, %c0_2] : memref<128x128xf32, #tpu.memory_space<vmem>>, vector<128x128xf32>
    %c0_3 = arith.constant 0 : index
    %c0_4 = arith.constant 0 : index
    %2 = vector.load %arg2[%c0_3, %c0_4] : memref<1x128xf32, #tpu.memory_space<vmem>>, vector<1x128xf32>
    %c0_5 = arith.constant 0 : index
    %c0_6 = arith.constant 0 : index
    %3 = vector.load %arg3[%c0_5, %c0_6] : memref<128x128xf32, #tpu.memory_space<vmem>>, vector<128x128xf32>
    %c0_7 = arith.constant 0 : index
    %c0_8 = arith.constant 0 : index
    %4 = vector.load %arg4[%c0_7, %c0_8] : memref<1x128xf32, #tpu.memory_space<vmem>>, vector<1x128xf32>
    %cst = arith.constant dense<0.000000e+00> : vector<8x128xf32>
    %5 = tpu.matmul %0, %1, %cst {dimension_numbers = #tpu.dot_dimension_numbers<[1], [0], [0], [1], [0, 0, 1, 1], [], []>} : vector<8x128xf32>, vector<128x128xf32>, vector<8x128xf32> -> vector<8x128xf32>
    %6 = vector.broadcast %2 : vector<1x128xf32> to vector<8x128xf32>
    %7 = arith.addf %5, %6 : vector<8x128xf32>
    %cst_9 = arith.constant 0.000000e+00 : f32
    %8 = vector.broadcast %cst_9 : f32 to vector<8x128xf32>
    %9 = arith.maximumf %7, %8 : vector<8x128xf32>
    %cst_10 = arith.constant dense<0.000000e+00> : vector<8x128xf32>
    %10 = tpu.matmul %9, %3, %cst_10 {dimension_numbers = #tpu.dot_dimension_numbers<[1], [0], [0], [1], [0, 0, 1, 1], [], []>} : vector<8x128xf32>, vector<128x128xf32>, vector<8x128xf32> -> vector<8x128xf32>
    %11 = vector.broadcast %4 : vector<1x128xf32> to vector<8x128xf32>
    %12 = arith.addf %10, %11 : vector<8x128xf32>
    %13 = arith.addf %0, %12 : vector<8x128xf32>
    %c0_11 = arith.constant 0 : index
    %c0_12 = arith.constant 0 : index
    %14 = vector.load %arg5[%c0_11, %c0_12] : memref<8x128xf32, #tpu.memory_space<vmem>>, vector<8x128xf32>
    tpu.vector_store %arg5[%c0_11, %c0_12], %12 {strides = array<i32>} : memref<8x128xf32, #tpu.memory_space<vmem>>, vector<8x128xf32>,
    %c0_13 = arith.constant 0 : index
    %c0_14 = arith.constant 0 : index
    %15 = vector.load %arg6[%c0_13, %c0_14] : memref<8x128xf32, #tpu.memory_space<vmem>>, vector<8x128xf32>
    tpu.vector_store %arg6[%c0_13, %c0_14], %13 {strides = array<i32>} : memref<8x128xf32, #tpu.memory_space<vmem>>, vector<8x128xf32>,
    return
  }
}

</mosaic_0001>

<bundles_post_ra>
// kernel: run_padded.1
= control target key start
LH: loop header
LB: loop body
LE: loop exit
PB: predicated region body
PF: predicated region fallthrough
CT: control target
= control target key end

     0   :  { %12 = vsyncpa [#allocation3], 0  ;;  %s649_s0 = inlined_call_operand.vmem [shape: f32[8,128], index: 0, kind: input, shape index: {}]   ;;  %s650_s1 = inlined_call_operand.hbm [shape: f32[128,128], index: 1, kind: input, shape index: {}]   ;;  %s651_s2 = inlined_call_operand.vmem [shape: f32[1,128], index: 2, kind: input, shape index: {}]   ;;  %s652_s3 = inlined_call_operand.hbm [shape: f32[128,128], index: 3, kind: input, shape index: {}]   ;;  %s653_s4 = inlined_call_operand.vmem [shape: f32[1,128], index: 4, kind: input, shape index: {}]   ;;  %s654_s5 = inlined_call_operand.hbm [shape: f32[8,128], index: 5, kind: output, shape index: {0}]   ;;  %s655_s6 = inlined_call_operand.hbm [shape: f32[8,128], index: 6, kind: output, shape index: {1}]  }
   0x1   :  { %13 = vsyncpa [#allocation6], 0 }
   0x2   :  { %14 = vsyncpa [#allocation4], 0 }
   0x3   :  { %15 = vsyncpa [#allocation9], 0  ;;  %s532_s21 = smov [#allocation2]   ;;  %s436_s25 = scalar_lea.hbm %s650_s1, 2048 }
   0x4   :  { %s23_s22 = sshll.u32 %s532_s21, 4  ;;  %p437_p0 = scmp.ne.s32.totalorder %s650_s1, %s436_s25  ;;  %s24_s22 = int_to_ptr.vmem [resolvable:$true] %s23_s22 }
   0x5   :  { %p440_p1 = scmp.lt.u32.totalorder %s436_s25, %s650_s1 }
   0x7   :  { %p442_p2 = pnand %p440_p1, %p437_p0 }
   0x9   :  { %445 = shalt.err (!%p442_p2)
}
   0xa   :  { %s446_s30 = scalar_lea.vmem %s24_s22, 2048  ;;  %p451_p4 = scmp.lt.s32.totalorder %s24_s22, %s24_s22 }
   0xb   :  { %p447_p3 = scmp.ne.s32.totalorder %s24_s22, %s446_s30  ;;  %p452_p5 = scmp.lt.s32.totalorder %s446_s30, %s446_s30 }
   0xd   :  { %p453_p6 = por %p452_p5, %p451_p4 }
   0xf   :  { %p454_p7 = pnand %p453_p6, %p447_p3 }
  0x11   :  { %457 = shalt.err (!%p454_p7)
}
  0x12   :  { %s533_s7 = smov 128   ;;  %s534_s8 = smov 8  }
  0x13   :  { %29 = dma.hbm_to_vmem [thread:$0]  %s650_s1, 2048, %s24_s22, [#allocation3], %s533_s7, %s533_s7, %s534_s8  }
  0x14   :  { %s535_s11 = smov [#allocation5]   ;;  %s458_s15 = scalar_lea.hbm %s652_s3, 2048 }
  0x15   :  { %s37_s12 = sshll.u32 %s535_s11, 4  ;;  %p459_p8 = scmp.ne.s32.totalorder %s652_s3, %s458_s15  ;;  %s38_s12 = int_to_ptr.vmem [resolvable:$true] %s37_s12 }
  0x16   :  { %p462_p9 = scmp.lt.u32.totalorder %s458_s15, %s652_s3 }
  0x18   :  { %p464_p10 = pnand %p462_p9, %p459_p8 }
  0x1a   :  { %467 = shalt.err (!%p464_p10)
}
  0x1b   :  { %s468_s20 = scalar_lea.vmem %s38_s12, 2048  ;;  %p473_p12 = scmp.lt.s32.totalorder %s38_s12, %s38_s12 }
  0x1c   :  { %p469_p11 = scmp.ne.s32.totalorder %s38_s12, %s468_s20  ;;  %p474_p13 = scmp.lt.s32.totalorder %s468_s20, %s468_s20 }
  0x1e   :  { %p475_p0 = por %p474_p13, %p473_p12 }
  0x20   :  { %p476_p1 = pnand %p475_p0, %p469_p11 }
  0x22   :  { %479 = shalt.err (!%p476_p1)
}
  0x23   :  { %43 = dma.hbm_to_vmem [thread:$0]  %s652_s3, 2048, %s38_s12, [#allocation6], %s533_s7, %s533_s7, %s534_s8  }
  0x24   :  { %524 = dma.done.wait [#allocation3], 2048  }
  0x25   :  { %525 = vsyncadd [#allocation3], 4294965248 }
  0x26   :  { %526 = dma.done.wait [#allocation6], 2048  }
  0x27   :  { %527 = vsyncadd [#allocation6], 4294965248  ;;  %v536_v0 = vmov 0.0|0.0   ;;  %vm537_vm0 = vmmov 0   ;;  %v538_v1 = vmov 0.0   ;;  %v53_v2 = vld [vmem:[#allocation2] sm:$0xff] }
  0x28   :  { %379 = vmatprep.subr.bf16.mxu0 %v536_v0  ;;  %341 = vmatprep.mubr.msk.f32.mxu0 %vm537_vm0, %v538_v1  ;;  %v54_v3 = vld [vmem:[#allocation2 + $0x8] sm:$0xff]  ;;  %v55_v4 = vld [vmem:[#allocation2 + $0x10] sm:$0xff]  ;;  %v56_v6 = vld [vmem:[#allocation2 + $0x18] sm:$0xff]  ;;  %s540_s28 = smov [#allocation8]  }
  0x29   :  { %403 = vmatprep.subr.bf16.mxu1 %v536_v0  ;;  %376 = vmatprep.mubr.msk.f32.mxu1 %vm537_vm0, %v538_v1  ;;  %v380_v5 = vpack.c.bf16 %v54_v3, %v53_v2  ;;  %v383_v7 = vpack.c.bf16 %v56_v6, %v55_v4  ;;  %v57_v8 = vld [vmem:[#allocation2 + $0x20] sm:$0xff]  ;;  %v58_v9 = vld [vmem:[#allocation2 + $0x28] sm:$0xff]  ;;  %v72_v12 = vld [vmem:[#allocation5 + $0x10] sm:$0xff]  ;;  %s259_s29 = sshll.u32 %s540_s28, 4  ;;  %s260_s29 = int_to_ptr.vmem [resolvable:$true] %s259_s29 }
  0x2a   :  { %v70_v10 = vld [vmem:[#allocation5] sm:$0xff]  ;;  %v71_v11 = vld [vmem:[#allocation5 + $0x8] sm:$0xff]  ;;  %v73_v13 = vld [vmem:[#allocation5 + $0x18] sm:$0xff]  ;;  %v386_v14 = vpack.c.bf16 %v58_v9, %v57_v8 }
  0x2b   :  { %381 = vmatpush3.bf16.msra.mxu0 %v380_v5  ;;  %v404_v15 = vpack.c.bf16 %v71_v11, %v70_v10  ;;  %v59_v16 = vld [vmem:[#allocation2 + $0x30] sm:$0xff]  ;;  %v60_v17 = vld [vmem:[#allocation2 + $0x38] sm:$0xff]  ;;  %v407_v18 = vpack.c.bf16 %v73_v13, %v72_v12  ;;  %v74_v19 = vld [vmem:[#allocation5 + $0x20] sm:$0xff] }
  0x2c   :  { %382 = vmatprep.subr.bf16.mxu0 %v536_v0  ;;  %v75_v20 = vld [vmem:[#allocation5 + $0x28] sm:$0xff]  ;;  %v389_v21 = vpack.c.bf16 %v60_v17, %v59_v16  ;;  %v61_v22 = vld [vmem:[#allocation2 + $0x40] sm:$0xff]  ;;  %v76_v25 = vld [vmem:[#allocation5 + $0x30] sm:$0xff] }
  0x2d   :  { %405 = vmatpush3.bf16.msra.mxu1 %v404_v15  ;;  %v62_v23 = vld [vmem:[#allocation2 + $0x48] sm:$0xff]  ;;  %v410_v24 = vpack.c.bf16 %v75_v20, %v74_v19  ;;  %v77_v26 = vld [vmem:[#allocation5 + $0x38] sm:$0xff]  ;;  %v63_v28 = vld [vmem:[#allocation2 + $0x50] sm:$0xff] }
  0x2e   :  { %406 = vmatprep.subr.bf16.mxu1 %v536_v0  ;;  %v392_v27 = vpack.c.bf16 %v62_v23, %v61_v22  ;;  %v64_v29 = vld [vmem:[#allocation2 + $0x58] sm:$0xff]  ;;  %v413_v30 = vpack.c.bf16 %v77_v26, %v76_v25  ;;  %v78_v31 = vld [vmem:[#allocation5 + $0x40] sm:$0xff]  ;;  %v79_v32 = vld [vmem:[#allocation5 + $0x48] sm:$0xff] }
  0x2f   :  { %384 = vmatpush3.bf16.msra.mxu0 %v383_v7  ;;  %v395_v33 = vpack.c.bf16 %v64_v29, %v63_v28  ;;  %v65_v34 = vld [vmem:[#allocation2 + $0x60] sm:$0xff]  ;;  %v66_v35 = vld [vmem:[#allocation2 + $0x68] sm:$0xff]  ;;  %v416_v36 = vpack.c.bf16 %v79_v32, %v78_v31  ;;  %v80_v37 = vld [vmem:[#allocation5 + $0x50] sm:$0xff] }
  0x30   :  { %385 = vmatprep.subr.bf16.mxu0 %v536_v0  ;;  %v81_v38 = vld [vmem:[#allocation5 + $0x58] sm:$0xff]  ;;  %v398_v39 = vpack.c.bf16 %v66_v35, %v65_v34  ;;  %v67_v40 = vld [vmem:[#allocation2 + $0x70] sm:$0xff]  ;;  %v82_v43 = vld [vmem:[#allocation5 + $0x60] sm:$0xff] }
  0x31   :  { %408 = vmatpush3.bf16.msra.mxu1 %v407_v18  ;;  %v68_v41 = vld [vmem:[#allocation2 + $0x78] sm:$0xff]  ;;  %v419_v42 = vpack.c.bf16 %v81_v38, %v80_v37  ;;  %v83_v44 = vld [vmem:[#allocation5 + $0x68] sm:$0xff]  ;;  %v52_v47 = vld [vmem:[%s649_s0] sm:$0xff]  ;;  %s539_s0 = smov [#allocation7]  }
  0x32   :  { %409 = vmatprep.subr.bf16.mxu1 %v536_v0  ;;  %v401_v45 = vpack.c.bf16 %v68_v41, %v67_v40  ;;  %v422_v46 = vpack.c.bf16 %v83_v44, %v82_v43  ;;  %v84_v48 = vld [vmem:[#allocation5 + $0x70] sm:$0xff]  ;;  %v85_v49 = vld [vmem:[#allocation5 + $0x78] sm:$0xff]  ;;  %v273_v51 = vld [vmem:[%s651_s2] ss:$0 sm:$0xff]  ;;  %s249_s27 = sshll.u32 %s539_s0, 4  ;;  %s250_s27 = int_to_ptr.vmem [resolvable:$true] %s249_s27 }
  0x33   :  { %387 = vmatpush3.bf16.msra.mxu0 %v386_v14  ;;  %v425_v50 = vpack.c.bf16 %v85_v49, %v84_v48  ;;  %v274_v56 = vld [vmem:[%s653_s4] ss:$0 sm:$0xff]  ;;  %s480_s2 = scalar_lea.vmem %s250_s27, 128  ;;  %p485_p3 = scmp.lt.s32.totalorder %s250_s27, %s250_s27 }
  0x34   :  { %388 = vmatprep.subr.bf16.mxu0 %v536_v0  ;;  %p481_p2 = scmp.ne.s32.totalorder %s250_s27, %s480_s2  ;;  %p486_p4 = scmp.lt.s32.totalorder %s480_s2, %s480_s2 }
  0x35   :  { %411 = vmatpush3.bf16.msra.mxu1 %v410_v24 }
  0x36   :  { %412 = vmatprep.subr.bf16.mxu1 %v536_v0  ;;  %p487_p5 = por %p486_p4, %p485_p3 }
  0x37   :  { %390 = vmatpush3.bf16.msra.mxu0 %v389_v21 }
  0x38   :  { %391 = vmatprep.subr.bf16.mxu0 %v536_v0  ;;  %p488_p6 = pnand %p487_p5, %p481_p2 }
  0x39   :  { %414 = vmatpush3.bf16.msra.mxu1 %v413_v30 }
  0x3a   :  { %415 = vmatprep.subr.bf16.mxu1 %v536_v0 }
  0x3b   :  { %393 = vmatpush3.bf16.msra.mxu0 %v392_v27 }
  0x3c   :  { %394 = vmatprep.subr.bf16.mxu0 %v536_v0 }
  0x3d   :  { %417 = vmatpush3.bf16.msra.mxu1 %v416_v36 }
  0x3e   :  { %418 = vmatprep.subr.bf16.mxu1 %v536_v0 }
  0x3f   :  { %396 = vmatpush3.bf16.msra.mxu0 %v395_v33 }
  0x40   :  { %397 = vmatprep.subr.bf16.mxu0 %v536_v0 }
  0x41   :  { %420 = vmatpush3.bf16.msra.mxu1 %v419_v42 }
  0x42   :  { %421 = vmatprep.subr.bf16.mxu1 %v536_v0 }
  0x43   :  { %399 = vmatpush3.bf16.msra.mxu0 %v398_v39 }
  0x44   :  { %400 = vmatprep.subr.bf16.mxu0 %v536_v0 }
  0x45   :  { %423 = vmatpush3.bf16.msra.mxu1 %v422_v46 }
  0x46   :  { %424 = vmatprep.subr.bf16.mxu1 %v536_v0 }
  0x47   :  { %402 = vmatpush3.bf16.msra.mxu0 %v401_v45 }
  0x49   :  { %426 = vmatpush3.bf16.msra.mxu1 %v425_v50 }
  0x4a   :  { %342 = vmatmul.mubr.f32.vlgmr.msra.gmra.mrb[0].mxu0 %v52_v47 }
 0x11d   :  { %v159_v52 = vpop.f32.mrb[0].mxu0 }
 0x11e   :  { %v160_v53 = vadd.f32 %v273_v51, %v159_v52  ;;  %v343_v54 = vpop.f32.mrb[1].mxu0 }
 0x120   :  { %v163_v55 = vmax.f32 %v160_v53, 0.0 }
 0x122   :  { %377 = vmatmul.mubr.f32.vlgmr.msra.gmra.mrb[0].mxu1 %v163_v55 }
 0x1f5   :  { %v236_v57 = vpop.f32.mrb[0].mxu1 }
 0x1f6   :  { %v237_v58 = vadd.f32 %v274_v56, %v236_v57  ;;  %v378_v59 = vpop.f32.mrb[1].mxu1 }
 0x1f8   :  { %v240_v60 = vadd.f32 %v237_v58, %v52_v47  ;;  %241 = vst [vmem:[#allocation7] sm:$0xff] %v237_v58 }
 0x1f9   :  { %491 = shalt.err (!%p488_p6)
}
 0x1fa   :  { %s492_s7 = scalar_lea.hbm %s654_s5, 128 }
 0x1fb   :  { %p493_p7 = scmp.ne.s32.totalorder %s654_s5, %s492_s7  ;;  %p496_p8 = scmp.lt.u32.totalorder %s492_s7, %s654_s5 }
 0x1fd   :  { %p498_p9 = pnand %p496_p8, %p493_p7 }
 0x1ff   :  { %501 = shalt.err (!%p498_p9)
}
 0x200   :  { %252 = dma.vmem_to_hbm [thread:$0]  %s250_s27, 128, %s654_s5, [#allocation4]   ;;  %242 = vst [vmem:[#allocation8] sm:$0xff] %v240_v60 }
 0x201   :  { %s502_s14 = scalar_lea.vmem %s260_s29, 128  ;;  %p507_p11 = scmp.lt.s32.totalorder %s260_s29, %s260_s29 }
 0x202   :  { %p503_p10 = scmp.ne.s32.totalorder %s260_s29, %s502_s14  ;;  %p508_p12 = scmp.lt.s32.totalorder %s502_s14, %s502_s14 }
 0x204   :  { %p509_p13 = por %p508_p12, %p507_p11 }
 0x206   :  { %p510_p0 = pnand %p509_p13, %p503_p10 }
 0x208   :  { %513 = shalt.err (!%p510_p0)
}
 0x209   :  { %s514_s17 = scalar_lea.hbm %s655_s6, 128 }
 0x20a   :  { %p515_p1 = scmp.ne.s32.totalorder %s655_s6, %s514_s17  ;;  %p518_p2 = scmp.lt.u32.totalorder %s514_s17, %s655_s6 }
 0x20c   :  { %p520_p3 = pnand %p518_p2, %p515_p1 }
 0x20e   :  { %523 = shalt.err (!%p520_p3)
}
 0x20f   :  { %262 = dma.vmem_to_hbm [thread:$0]  %s260_s29, 128, %s655_s6, [#allocation9]  }
 0x210   :  { %528 = dma.done.wait [#allocation4], 128  }
 0x211   :  { %529 = vsyncadd [#allocation4], 4294967168 }
 0x212   :  { %530 = dma.done.wait [#allocation9], 128  }
 0x213   :  { %531 = vsyncadd [#allocation9], 4294967168 }
 0x214   :  { %269 = vsyncpa [#allocation3], 1 }
 0x215   :  { %270 = vsyncpa [#allocation6], 1 }
 0x216   :  { %271 = vsyncpa [#allocation4], 1 }
 0x217   :  { %272 = vsyncpa [#allocation9], 1 }

</bundles_post_ra>
